<compile_context>
chip_gen: v6e
topology: v6e:2x2x1
jax: 0.10.0
libtpu: 0.0.40
codegen_flags: <defaults>
</compile_context>

<pallas_src>
import jax
import jax.numpy as jnp
import numpy as np
from jax.experimental import pallas as pl
from jax.experimental.pallas import tpu as pltpu

IGNORE_INDEX = 255
_LANES = 128
_CHUNK = 64          # rows per in-kernel chunk: 8 f32 vregs per (chunk, 128) slice
_MAX_CHUNKS = 16     # bounds unrolled in-kernel code size; 16 * 64 = 1024 rows/tile


def _fold_accumulate(acc_ref, vals):
    """Accumulate (cr, 128) f32 `vals` into the (8, 128) accumulator ref using
    only sublane-aligned adds (no cross-lane work, no large temporaries)."""
    cr = vals.shape[0]
    cr8 = (cr // 8) * 8
    if cr8:
        folded = vals[0:8, :]
        for j in range(8, cr8, 8):
            folded = folded + vals[j:j + 8, :]
        acc_ref[...] = acc_ref[...] + folded
    if cr8 < cr:                                    # only for tiny row counts
        rem = cr - cr8
        acc_ref[0:rem, :] = acc_ref[0:rem, :] + vals[cr8:cr, :]


def _ce2d_kernel(x_ref, t_ref, sum_ref, cnt_ref):
    # x_ref   : (C, tile_rows, 128) logits, input dtype (cast to f32 per chunk)
    # t_ref   : (tile_rows, 128) targets, uint8 (or int32 when C > 255)
    # sum_ref, cnt_ref : (8, 128) f32 accumulators, resident across the inner
    #                    (reduction) grid axis.
    num_classes, tile_rows, _ = x_ref.shape

    @pl.when(pl.program_id(2) == 0)
    def _init():
        sum_ref[...] = jnp.zeros_like(sum_ref)
        cnt_ref[...] = jnp.zeros_like(cnt_ref)

    for r0 in range(0, tile_rows, _CHUNK):
        cr = min(_CHUNK, tile_rows - r0)

        t = t_ref[r0:r0 + cr, :].astype(jnp.int32)                  # (cr, 128)

        # Pass 1: per-pixel max over classes (class axis is major -> pure VPU).
        m = x_ref[0, r0:r0 + cr, :].astype(jnp.float32)
        for c in range(1, num_classes):
            m = jnp.maximum(m, x_ref[c, r0:r0 + cr, :].astype(jnp.float32))

        # Pass 2: exp-sum and the shifted logit of the target class (static
        # per-class selects instead of an iota one-hot).
        s = jnp.zeros((cr, _LANES), jnp.float32)
        z_t = jnp.zeros((cr, _LANES), jnp.float32)
        for c in range(num_classes):
            z = x_ref[c, r0:r0 + cr, :].astype(jnp.float32) - m
            s = s + jnp.exp(z)
            z_t = z_t + jnp.where(t == c, z, 0.0)

        valid = t != IGNORE_INDEX
        # -log p[target] = log(sum exp(x - m)) - (x_t - m); ignored pixels -> 0.
        loss = jnp.where(valid, jnp.log(s) - z_t, 0.0)              # (cr, 128)
        cnt = valid.astype(jnp.float32)

        _fold_accumulate(sum_ref, loss)
        _fold_accumulate(cnt_ref, cnt)


def cross_entropy_loss_2d(inputs, targets, *, target_block_bytes=4 * 1024 * 1024,
                          max_tile_rows=None):
    """inputs: (N, C, H, W) float (f32 or bf16); targets: (N, H, W) int with
    ignore_index = 255. Returns the scalar mean loss over non-ignored pixels
    (weight=None, size_average=True, reduce=True)."""
    N, C, H, W = inputs.shape
    P = H * W
    itemsize = jnp.dtype(inputs.dtype).itemsize
    t_dtype = jnp.uint8 if C <= 255 else jnp.int32

    x = inputs.reshape(N, C, P)                     # free reshape (contiguous)
    t = targets.reshape(N, P).astype(t_dtype)
    if P % _LANES:
        # Lane-dense layout needs a multiple of 128 pixels. This (small) pad
        # copies the logits; it is only hit when H*W % 128 != 0.
        pad_px = (-P) % _LANES
        x = jnp.pad(x, ((0, 0), (0, 0), (0, pad_px)))
        t = jnp.pad(t, ((0, 0), (0, pad_px)), constant_values=IGNORE_INDEX)
    rows = x.shape[-1] // _LANES
    x = x.reshape(N, C, rows, _LANES)
    t = t.reshape(N, rows, _LANES)

    # Pixel-tile rows: ~target_block_bytes of logits per block, bounded by the
    # unrolled in-kernel chunk count, multiple of 32 unless one tile covers all.
    cap_rows = max(1, int(target_block_bytes // (C * _LANES * itemsize)))
    cap_rows = min(cap_rows, _CHUNK * _MAX_CHUNKS)
    if max_tile_rows is not None:
        cap_rows = min(cap_rows, max_tile_rows)
    cap_rows = max(32, (cap_rows // 32) * 32)
    tile_rows = rows if rows <= cap_rows else cap_rows
    n_tiles = -(-rows // tile_rows)

    # Ragged last tile: pad only the tiny targets array with IGNORE_INDEX; the
    # logits' last block reads out-of-bounds garbage which the mask drops.
    rows_t = n_tiles * tile_rows
    if rows_t != rows:
        t = jnp.pad(t, ((0, 0), (0, rows_t - rows), (0, 0)),
                    constant_values=IGNORE_INDEX)

    # Second "parallel" axis over pixel super-tiles so both v7x TensorCores are
    # used when N is odd/1 (neutral on v5e/v6e).
    if N % 2 == 1 and n_tiles >= 2 and n_tiles % 2 == 0:
        n_outer = 2
    else:
        n_outer = 1
    n_inner = n_tiles // n_outer

    grid = (N, n_outer, n_inner)

    loss_sum, count = pl.pallas_call(
        _ce2d_kernel,
        out_shape=(
            jax.ShapeDtypeStruct((N, n_outer, 8, _LANES), jnp.float32),
            jax.ShapeDtypeStruct((N, n_outer, 8, _LANES), jnp.float32),
        ),
        grid_spec=pltpu.PrefetchScalarGridSpec(
            num_scalar_prefetch=0,
            grid=grid,
            in_specs=[
                pl.BlockSpec((None, C, tile_rows, _LANES),
                             lambda n, o, i: (n, 0, o * n_inner + i, 0)),
                pl.BlockSpec((None, tile_rows, _LANES),
                             lambda n, o, i: (n, o * n_inner + i, 0)),
            ],
            out_specs=[
                pl.BlockSpec((None, None, 8, _LANES),
                             lambda n, o, i: (n, o, 0, 0)),
                pl.BlockSpec((None, None, 8, _LANES),
                             lambda n, o, i: (n, o, 0, 0)),
            ],
        ),
        compiler_params=pltpu.CompilerParams(
            dimension_semantics=("parallel", "parallel", "arbitrary"),
            vmem_limit_bytes=48 * 1024 * 1024,
        ),
    )(x, t)

    # Tiny final reduction + mean-over-valid in plain XLA.
    return jnp.sum(loss_sum) / jnp.sum(count)


def _reference(inputs, targets):
    logp = jax.nn.log_softmax(inputs.astype(jnp.float32), axis=1)   # (N,C,H,W)
    t = targets.astype(jnp.int32)
    valid = t != IGNORE_INDEX
    t_safe = jnp.where(valid, t, 0)
    picked = jnp.take_along_axis(logp, t_safe[:, None, :, :], axis=1)[:, 0]
    loss = jnp.where(valid, -picked, 0.0)
    return jnp.sum(loss) / jnp.sum(valid.astype(jnp.float32))


if __name__ == "__main__":
    key = jax.random.PRNGKey(0)

    # Test 1: the spec's nominal small shape (single pixel tile, f32).
    k1, k2, k3 = jax.random.split(jax.random.fold_in(key, 1), 3)
    N, C, H, W = 2, 4, 16, 16
    x1 = jax.random.normal(k1, (N, C, H, W), dtype=jnp.float32)
    t1 = jax.random.randint(k2, (N, H, W), 0, C, dtype=jnp.int32)
    t1 = jnp.where(jax.random.bernoulli(k3, 0.1, (N, H, W)), IGNORE_INDEX, t1)
    out1 = cross_entropy_loss_2d(x1, t1)
    jax.block_until_ready(out1)
    ref1 = _reference(x1, t1)
    assert np.allclose(np.asarray(out1), np.asarray(ref1), rtol=1e-4, atol=1e-5), (
        float(out1), float(ref1))

    # Test 2: bf16 logits, N=1, multiple pixel tiles with a ragged last tile
    # (exercises the no-logits-pad path and the extra parallel axis).
    k1, k2, k3 = jax.random.split(jax.random.fold_in(key, 2), 3)
    N, C, H, W = 1, 5, 80, 80          # P = 6400 -> 50 lane-rows
    x2 = jax.random.normal(k1, (N, C, H, W), dtype=jnp.float32).astype(jnp.bfloat16)
    t2 = jax.random.randint(k2, (N, H, W), 0, C, dtype=jnp.int32)
    t2 = jnp.where(jax.random.bernoulli(k3, 0.2, (N, H, W)), IGNORE_INDEX, t2)
    out2 = cross_entropy_loss_2d(x2, t2, max_tile_rows=32)   # 2 tiles: 32 + ragged 18
    jax.block_until_ready(out2)
    ref2 = _reference(x2, t2)
    assert np.allclose(np.asarray(out2), np.asarray(ref2), rtol=1e-4, atol=1e-4), (
        float(out2), float(ref2))

    print("KERNEL_OK")
</pallas_src>

<mosaic_0001>
module attributes {stable_mosaic.version = 11 : i64} {
  func.func @_ce2d_kernel(%arg0: i32, %arg1: i32, %arg2: i32, %arg3: memref<1x4x2x128xf32, #tpu.memory_space<vmem>>, %arg4: memref<1x2x128xi8, #tpu.memory_space<vmem>>, %arg5: memref<1x1x8x128xf32, #tpu.memory_space<vmem>>, %arg6: memref<1x1x8x128xf32, #tpu.memory_space<vmem>>) attributes {dimension_semantics = [#tpu.dimension_semantics<parallel>, #tpu.dimension_semantics<parallel>, #tpu.dimension_semantics<arbitrary>], iteration_bounds = array<i64: 2, 1, 1>, scalar_prefetch = 0 : i64, scratch_operands = 0 : i64, tpu.core_type = #tpu.core_type<tc>, window_params = [{transform_indices = @transform_0, window_bounds = array<i64: 1, 4, 2, 128>}, {transform_indices = @transform_1, window_bounds = array<i64: 1, 2, 128>}, {transform_indices = @transform_2, window_bounds = array<i64: 1, 1, 8, 128>}, {transform_indices = @transform_3, window_bounds = array<i64: 1, 1, 8, 128>}]} {
    %c0_i32 = arith.constant 0 : i32
    %0 = arith.cmpi eq, %arg2, %c0_i32 : i32
    %1 = arith.extui %0 : i1 to i32
    %c0_i32_0 = arith.constant 0 : i32
    %2 = arith.cmpi ne, %1, %c0_i32_0 : i32
    scf.if %2 {
      %cst_55 = arith.constant 0.000000e+00 : f32
      %79 = vector.broadcast %cst_55 : f32 to vector<8x128xf32>
      %c0_56 = arith.constant 0 : index
      %c0_57 = arith.constant 0 : index
      %c0_58 = arith.constant 0 : index
      %c0_59 = arith.constant 0 : index
      %80 = vector.load %arg5[%c0_56, %c0_57, %c0_58, %c0_59] : memref<1x1x8x128xf32, #tpu.memory_space<vmem>>, vector<1x1x8x128xf32>
      %81 = vector.shape_cast %80 : vector<1x1x8x128xf32> to vector<8x128xf32>
      %82 = vector.shape_cast %79 : vector<8x128xf32> to vector<1x1x8x128xf32>
      tpu.vector_store %arg5[%c0_56, %c0_57, %c0_58, %c0_59], %82 {strides = array<i32>} : memref<1x1x8x128xf32, #tpu.memory_space<vmem>>, vector<1x1x8x128xf32>,
      %cst_60 = arith.constant 0.000000e+00 : f32
      %83 = vector.broadcast %cst_60 : f32 to vector<8x128xf32>
      %c0_61 = arith.constant 0 : index
      %c0_62 = arith.constant 0 : index
      %c0_63 = arith.constant 0 : index
      %c0_64 = arith.constant 0 : index
      %84 = vector.load %arg6[%c0_61, %c0_62, %c0_63, %c0_64] : memref<1x1x8x128xf32, #tpu.memory_space<vmem>>, vector<1x1x8x128xf32>
      %85 = vector.shape_cast %84 : vector<1x1x8x128xf32> to vector<8x128xf32>
      %86 = vector.shape_cast %83 : vector<8x128xf32> to vector<1x1x8x128xf32>
      tpu.vector_store %arg6[%c0_61, %c0_62, %c0_63, %c0_64], %86 {strides = array<i32>} : memref<1x1x8x128xf32, #tpu.memory_space<vmem>>, vector<1x1x8x128xf32>,
    } else {
    }
    %c0 = arith.constant 0 : index
    %c0_1 = arith.constant 0 : index
    %c0_2 = arith.constant 0 : index
    %3 = vector.load %arg4[%c0, %c0_1, %c0_2] : memref<1x2x128xi8, #tpu.memory_space<vmem>>, vector<1x2x128xi8>
    %4 = vector.shape_cast %3 : vector<1x2x128xi8> to vector<2x128xi8>
    %5 = arith.extui %4 : vector<2x128xi8> to vector<2x128xi32>
    %c0_3 = arith.constant 0 : index
    %c0_4 = arith.constant 0 : index
    %c0_5 = arith.constant 0 : index
    %c0_6 = arith.constant 0 : index
    %6 = vector.load %arg3[%c0_3, %c0_4, %c0_5, %c0_6] : memref<1x4x2x128xf32, #tpu.memory_space<vmem>>, vector<1x1x2x128xf32>
    %7 = vector.shape_cast %6 : vector<1x1x2x128xf32> to vector<2x128xf32>
    %c0_7 = arith.constant 0 : index
    %c1 = arith.constant 1 : index
    %c0_8 = arith.constant 0 : index
    %c0_9 = arith.constant 0 : index
    %8 = vector.load %arg3[%c0_7, %c1, %c0_8, %c0_9] : memref<1x4x2x128xf32, #tpu.memory_space<vmem>>, vector<1x1x2x128xf32>
    %9 = vector.shape_cast %8 : vector<1x1x2x128xf32> to vector<2x128xf32>
    %10 = arith.maximumf %7, %9 : vector<2x128xf32>
    %c0_10 = arith.constant 0 : index
    %c2 = arith.constant 2 : index
    %c0_11 = arith.constant 0 : index
    %c0_12 = arith.constant 0 : index
    %11 = vector.load %arg3[%c0_10, %c2, %c0_11, %c0_12] : memref<1x4x2x128xf32, #tpu.memory_space<vmem>>, vector<1x1x2x128xf32>
    %12 = vector.shape_cast %11 : vector<1x1x2x128xf32> to vector<2x128xf32>
    %13 = arith.maximumf %10, %12 : vector<2x128xf32>
    %c0_13 = arith.constant 0 : index
    %c3 = arith.constant 3 : index
    %c0_14 = arith.constant 0 : index
    %c0_15 = arith.constant 0 : index
    %14 = vector.load %arg3[%c0_13, %c3, %c0_14, %c0_15] : memref<1x4x2x128xf32, #tpu.memory_space<vmem>>, vector<1x1x2x128xf32>
    %15 = vector.shape_cast %14 : vector<1x1x2x128xf32> to vector<2x128xf32>
    %16 = arith.maximumf %13, %15 : vector<2x128xf32>
    %cst = arith.constant 0.000000e+00 : f32
    %17 = vector.broadcast %cst : f32 to vector<2x128xf32>
    %cst_16 = arith.constant 0.000000e+00 : f32
    %18 = vector.broadcast %cst_16 : f32 to vector<2x128xf32>
    %c0_17 = arith.constant 0 : index
    %c0_18 = arith.constant 0 : index
    %c0_19 = arith.constant 0 : index
    %c0_20 = arith.constant 0 : index
    %19 = vector.load %arg3[%c0_17, %c0_18, %c0_19, %c0_20] : memref<1x4x2x128xf32, #tpu.memory_space<vmem>>, vector<1x1x2x128xf32>
    %20 = vector.shape_cast %19 : vector<1x1x2x128xf32> to vector<2x128xf32>
    %21 = arith.subf %20, %16 : vector<2x128xf32>
    %22 = math.exp %21 : vector<2x128xf32>
    %23 = arith.addf %17, %22 : vector<2x128xf32>
    %c0_i32_21 = arith.constant 0 : i32
    %24 = vector.broadcast %c0_i32_21 : i32 to vector<2x128xi32>
    %25 = arith.cmpi eq, %5, %24 : vector<2x128xi32>
    %cst_22 = arith.constant 0.000000e+00 : f32
    %26 = vector.broadcast %cst_22 : f32 to vector<2x128xf32>
    %27 = arith.select %25, %21, %26 : vector<2x128xi1>, vector<2x128xf32>
    %28 = arith.addf %18, %27 : vector<2x128xf32>
    %c0_23 = arith.constant 0 : index
    %c1_24 = arith.constant 1 : index
    %c0_25 = arith.constant 0 : index
    %c0_26 = arith.constant 0 : index
    %29 = vector.load %arg3[%c0_23, %c1_24, %c0_25, %c0_26] : memref<1x4x2x128xf32, #tpu.memory_space<vmem>>, vector<1x1x2x128xf32>
    %30 = vector.shape_cast %29 : vector<1x1x2x128xf32> to vector<2x128xf32>
    %31 = arith.subf %30, %16 : vector<2x128xf32>
    %32 = math.exp %31 : vector<2x128xf32>
    %33 = arith.addf %23, %32 : vector<2x128xf32>
    %c1_i32 = arith.constant 1 : i32
    %34 = vector.broadcast %c1_i32 : i32 to vector<2x128xi32>
    %35 = arith.cmpi eq, %5, %34 : vector<2x128xi32>
    %cst_27 = arith.constant 0.000000e+00 : f32
    %36 = vector.broadcast %cst_27 : f32 to vector<2x128xf32>
    %37 = arith.select %35, %31, %36 : vector<2x128xi1>, vector<2x128xf32>
    %38 = arith.addf %28, %37 : vector<2x128xf32>
    %c0_28 = arith.constant 0 : index
    %c2_29 = arith.constant 2 : index
    %c0_30 = arith.constant 0 : index
    %c0_31 = arith.constant 0 : index
    %39 = vector.load %arg3[%c0_28, %c2_29, %c0_30, %c0_31] : memref<1x4x2x128xf32, #tpu.memory_space<vmem>>, vector<1x1x2x128xf32>
    %40 = vector.shape_cast %39 : vector<1x1x2x128xf32> to vector<2x128xf32>
    %41 = arith.subf %40, %16 : vector<2x128xf32>
    %42 = math.exp %41 : vector<2x128xf32>
    %43 = arith.addf %33, %42 : vector<2x128xf32>
    %c2_i32 = arith.constant 2 : i32
    %44 = vector.broadcast %c2_i32 : i32 to vector<2x128xi32>
    %45 = arith.cmpi eq, %5, %44 : vector<2x128xi32>
    %cst_32 = arith.constant 0.000000e+00 : f32
    %46 = vector.broadcast %cst_32 : f32 to vector<2x128xf32>
    %47 = arith.select %45, %41, %46 : vector<2x128xi1>, vector<2x128xf32>
    %48 = arith.addf %38, %47 : vector<2x128xf32>
    %c0_33 = arith.constant 0 : index
    %c3_34 = arith.constant 3 : index
    %c0_35 = arith.constant 0 : index
    %c0_36 = arith.constant 0 : index
    %49 = vector.load %arg3[%c0_33, %c3_34, %c0_35, %c0_36] : memref<1x4x2x128xf32, #tpu.memory_space<vmem>>, vector<1x1x2x128xf32>
    %50 = vector.shape_cast %49 : vector<1x1x2x128xf32> to vector<2x128xf32>
    %51 = arith.subf %50, %16 : vector<2x128xf32>
    %52 = math.exp %51 : vector<2x128xf32>
    %53 = arith.addf %43, %52 : vector<2x128xf32>
    %c3_i32 = arith.constant 3 : i32
    %54 = vector.broadcast %c3_i32 : i32 to vector<2x128xi32>
    %55 = arith.cmpi eq, %5, %54 : vector<2x128xi32>
    %cst_37 = arith.constant 0.000000e+00 : f32
    %56 = vector.broadcast %cst_37 : f32 to vector<2x128xf32>
    %57 = arith.select %55, %51, %56 : vector<2x128xi1>, vector<2x128xf32>
    %58 = arith.addf %48, %57 : vector<2x128xf32>
    %c255_i32 = arith.constant 255 : i32
    %59 = vector.broadcast %c255_i32 : i32 to vector<2x128xi32>
    %60 = arith.cmpi ne, %5, %59 : vector<2x128xi32>
    %61 = math.log %53 : vector<2x128xf32>
    %62 = arith.subf %61, %58 : vector<2x128xf32>
    %cst_38 = arith.constant 0.000000e+00 : f32
    %63 = vector.broadcast %cst_38 : f32 to vector<2x128xf32>
    %64 = arith.select %60, %62, %63 : vector<2x128xi1>, vector<2x128xf32>
    %65 = arith.extui %60 : vector<2x128xi1> to vector<2x128xi32>
    %66 = arith.sitofp %65 : vector<2x128xi32> to vector<2x128xf32>
    %c0_39 = arith.constant 0 : index
    %c0_40 = arith.constant 0 : index
    %c0_41 = arith.constant 0 : index
    %c0_42 = arith.constant 0 : index
    %67 = vector.load %arg5[%c0_39, %c0_40, %c0_41, %c0_42] : memref<1x1x8x128xf32, #tpu.memory_space<vmem>>, vector<1x1x2x128xf32>
    %68 = vector.shape_cast %67 : vector<1x1x2x128xf32> to vector<2x128xf32>
    %69 = arith.addf %68, %64 : vector<2x128xf32>
    %c0_43 = arith.constant 0 : index
    %c0_44 = arith.constant 0 : index
    %c0_45 = arith.constant 0 : index
    %c0_46 = arith.constant 0 : index
    %70 = vector.load %arg5[%c0_43, %c0_44, %c0_45, %c0_46] : memref<1x1x8x128xf32, #tpu.memory_space<vmem>>, vector<1x1x2x128xf32>
    %71 = vector.shape_cast %70 : vector<1x1x2x128xf32> to vector<2x128xf32>
    %72 = vector.shape_cast %69 : vector<2x128xf32> to vector<1x1x2x128xf32>
    tpu.vector_store %arg5[%c0_43, %c0_44, %c0_45, %c0_46], %72 {strides = array<i32>} : memref<1x1x8x128xf32, #tpu.memory_space<vmem>>, vector<1x1x2x128xf32>,
    %c0_47 = arith.constant 0 : index
    %c0_48 = arith.constant 0 : index
    %c0_49 = arith.constant 0 : index
    %c0_50 = arith.constant 0 : index
    %73 = vector.load %arg6[%c0_47, %c0_48, %c0_49, %c0_50] : memref<1x1x8x128xf32, #tpu.memory_space<vmem>>, vector<1x1x2x128xf32>
    %74 = vector.shape_cast %73 : vector<1x1x2x128xf32> to vector<2x128xf32>
    %75 = arith.addf %74, %66 : vector<2x128xf32>
    %c0_51 = arith.constant 0 : index
    %c0_52 = arith.constant 0 : index
    %c0_53 = arith.constant 0 : index
    %c0_54 = arith.constant 0 : index
    %76 = vector.load %arg6[%c0_51, %c0_52, %c0_53, %c0_54] : memref<1x1x8x128xf32, #tpu.memory_space<vmem>>, vector<1x1x2x128xf32>
    %77 = vector.shape_cast %76 : vector<1x1x2x128xf32> to vector<2x128xf32>
    %78 = vector.shape_cast %75 : vector<2x128xf32> to vector<1x1x2x128xf32>
    tpu.vector_store %arg6[%c0_51, %c0_52, %c0_53, %c0_54], %78 {strides = array<i32>} : memref<1x1x8x128xf32, #tpu.memory_space<vmem>>, vector<1x1x2x128xf32>,
    return
  }
  func.func @transform_0(%arg0: i32, %arg1: i32, %arg2: i32) -> (i32, i32, i32, i32) {
    %c1_i32 = arith.constant 1 : i32
    %0 = arith.muli %arg1, %c1_i32 : i32
    %1 = arith.addi %0, %arg2 : i32
    %c0_i32 = arith.constant 0 : i32
    %c0_i32_0 = arith.constant 0 : i32
    %c0_i32_1 = arith.constant 0 : i32
    return %arg0, %c0_i32, %1, %c0_i32_0 : i32, i32, i32, i32
  }
  func.func @transform_1(%arg0: i32, %arg1: i32, %arg2: i32) -> (i32, i32, i32) {
    %c1_i32 = arith.constant 1 : i32
    %0 = arith.muli %arg1, %c1_i32 : i32
    %1 = arith.addi %0, %arg2 : i32
    %c0_i32 = arith.constant 0 : i32
    %c0_i32_0 = arith.constant 0 : i32
    return %arg0, %1, %c0_i32 : i32, i32, i32
  }
  func.func @transform_2(%arg0: i32, %arg1: i32, %arg2: i32) -> (i32, i32, i32, i32) {
    %c0_i32 = arith.constant 0 : i32
    %c0_i32_0 = arith.constant 0 : i32
    %c0_i32_1 = arith.constant 0 : i32
    return %arg0, %arg1, %c0_i32, %c0_i32_0 : i32, i32, i32, i32
  }
  func.func @transform_3(%arg0: i32, %arg1: i32, %arg2: i32) -> (i32, i32, i32, i32) {
    %c0_i32 = arith.constant 0 : i32
    %c0_i32_0 = arith.constant 0 : i32
    %c0_i32_1 = arith.constant 0 : i32
    return %arg0, %arg1, %c0_i32, %c0_i32_0 : i32, i32, i32, i32
  }
}

</mosaic_0001>

<bundles_post_ra>
// kernel: tpu_custom_call.1
= control target key start
LH: loop header
LB: loop body
LE: loop exit
PB: predicated region body
PF: predicated region fallthrough
CT: control target
= control target key end

     0   :  { %9 = vsyncpa [#allocation3], 0  ;;  %s1035_s0 = inlined_call_operand.hbm [shape: f32[2,4,2,128], index: 0, kind: input, shape index: {}]   ;;  %s1036_s1 = inlined_call_operand.hbm [shape: u8[2,2,128], index: 1, kind: input, shape index: {}]   ;;  %s1037_s2 = inlined_call_operand.hbm [shape: f32[2,1,8,128], index: 2, kind: output, shape index: {0}]   ;;  %s1038_s3 = inlined_call_operand.hbm [shape: f32[2,1,8,128], index: 3, kind: output, shape index: {1}]  }
   0x1   :  { %11 = vsyncpa [#allocation3 + $0x1], 0 }
   0x2   :  { %12 = vsyncpa [#allocation6], 0 }
   0x3   :  { %14 = vsyncpa [#allocation6 + $0x1], 0 }
   0x4   :  { %15 = vsyncpa [#allocation4], 0 }
   0x5   :  { %17 = vsyncpa [#allocation4 + $0x1], 0 }
   0x6   :  { %18 = vsyncpa [#allocation9], 0 }
   0x7   :  { %20 = vsyncpa [#allocation9 + $0x1], 0  ;;  %s812_s12 = smov 0   ;;  %s814_s13 = smov 0  }
   0x8   :  { %s816_s14 = smov 0   ;;  %s818_s15 = smov 0  }
   0x9   :  { %s820_s16 = smov 0   ;;  %s822_s17 = smov 0  }
   0xa LB: > { %s505_s18 = sadd.s32 4294967295, %s783_s17   ;;  %s506_s19 = sadd.s32 4294967294, %s783_s17   ;;  %s783_s17 = sphi %s822_s17, %s26_s17   ;;  %s779_s16 = sphi %s820_s16, %s1050_s16   ;;  %s775_s15 = sphi %s818_s15, %s1049_s15   ;;  %s771_s14 = sphi %s816_s14, %s1048_s14   ;;  %s767_s13 = sphi %s814_s13, %s1047_s13   ;;  %s763_s12 = sphi %s812_s12, %s1046_s12  }
   0xb   : > { %s45_s20 = sadd.s32 1, %s779_s16  ;;  %s56_s21 = sadd.s32 1, %s771_s14 }
   0xc   : > { %p47_p0 = scmp.ge.s32.totalorder %s45_s20, 2  ;;  %p63_p1 = scmp.ne.s32.totalorder %s771_s14, %s767_s13 }
   0xd   : > { %p64_p2 = scmp.eq.s32.totalorder %s783_s17, 0  ;;  %p69_p3 = scmp.ne.s32.totalorder %s767_s13, %s763_s12 }
   0xe   : > { %s1052_s20 = smov (%p47_p0, %s45_s20), 0  ;;  %p70_p5 = scmp.eq.s32.totalorder %s505_s18, 0 }
   0xf   : > { %p853_p4 = por %p64_p2, %p63_p1  ;;  %s51_s23 = ssub.s32 %s779_s16, %s1052_s20 }
  0x10   : > { %p125_p6 = scmp.eq.s32.totalorder %s505_s18, 1  ;;  %p54_p7 = scmp.eq.s32.totalorder %s51_s23, 0 }
  0x11   : > { %p859_p8 = por %p70_p5, %p69_p3  ;;  %p131_p10 = scmp.eq.s32.totalorder %s506_s19, 1 }
  0x12   : > { %p863_p9 = por %p125_p6, %p63_p1  ;;  %p550_p13 = scmp.lt.s32.totalorder %s783_s17, 2 }
  0x13   : > { %s868_s26 = scalar_select %p54_p7, %s771_s14, %s56_s21  }
  0x14   : > { %p870_p11 = por %p131_p10, %p69_p3  ;;  %s877_s28 = sand.u32 1, %s771_s14  }
  0x15   : > { %s509_s29 = sshll.u32 %s877_s28, 3  ;;  %s527_s30 = sshll.u32 %s779_s16, 7 }
  0x16   : > { %s191_s6 = scalar_lea.hbm %s1035_s0, %s527_s30  ;;  %s183_s7 = scalar_lea.vmem [#allocation2], %s509_s29 }
  0x17   : > { %s192_s8 = sshll.u32 %s183_s7, 4  ;;  %p886_p0 = pnand %p550_p13, %p853_p4  ;;  %s193_s8 = int_to_ptr.vmem [resolvable:$true] %s192_s8 }
  0x18   : > { %p513_p1 = scmp.ge.s32.totalorder %s783_s17, 1  ;;  %s180_s10 = scalar_lea.sflag [#allocation3], %s877_s28 }
  0x19   : > { %p615_p2 = pneg %p886_p0  ;;  %s626_s11 = scalar_lea.vmem %s193_s8, 128 }
  0x1a   : > { %p627_p3 = scmp.ne.s32.totalorder %s193_s8, %s626_s11  ;;  %s785_s18 = smov [#allocation2]  }
  0x1b   : > { %s631_s19 = sshll.u32 %s785_s18, 4  ;;  %s632_s19 = int_to_ptr.vmem [resolvable:$false] %s631_s19 }
  0x1c   : > { %p629_p5 = pnand %p627_p3, %p615_p2  ;;  %s633_s21 = scalar_lea.vmem %s632_s19, 256 }
  0x1d   : > { %p634_p4 = scmp.lt.s32.totalorder %s193_s8, %s632_s19  ;;  %p635_p7 = scmp.lt.s32.totalorder %s633_s21, %s626_s11 }
  0x1e   : > { %p630_p6 = pneg %p629_p5 }
  0x1f   : > { %p636_p10 = por %p635_p7, %p634_p4 }
  0x21   : > { %p637_p13 = pnand %p636_p10, %p630_p6 }
  0x23   : > { %640 = shalt.err (!%p637_p13)
}
  0x24   : > { %s786_s22 = smov 32   ;;  %s787_s23 = smov 2  }
  0x25   : > { %539 = dma.hbm_to_vmem [thread:$0]  (!%p886_p0), %s191_s6, 128, %s193_s8, %s180_s10, %s786_s22, %s786_s22, %s787_s23  }
  0x26   : > { %p219_p3 = scmp.lt.s32.totalorder %s783_s17, 3  ;;  %s512_s29 = sshll.u32 %s779_s16, 4 }
  0x27   : > { %s212_s7 = scalar_lea.hbm %s1036_s1, %s512_s29  ;;  %s205_s11 = scalar_lea.vmem [#allocation5], %s877_s28 }
  0x28   : > { %p903_p5 = pnand %p513_p1, %p219_p3  ;;  %s214_s18 = sshll.u32 %s205_s11, 4  ;;  %s215_s18 = int_to_ptr.vmem [resolvable:$true] %s214_s18 }
  0x29   : > { %s203_s19 = scalar_lea.sflag [#allocation6], %s877_s28  ;;  %s654_s21 = scalar_lea.vmem %s215_s18, 16 }
  0x2a   : > { %p655_p6 = scmp.ne.s32.totalorder %s215_s18, %s654_s21  ;;  %s788_s6 = smov [#allocation5]  }
  0x2b   : > { %s659_s8 = sshll.u32 %s788_s6, 4  ;;  %s660_s8 = int_to_ptr.vmem [resolvable:$false] %s659_s8 }
  0x2c   : > { %p657_p4 = pnand %p655_p6, %p615_p2  ;;  %s661_s10 = scalar_lea.vmem %s660_s8, 32 }
  0x2d   : > { %p662_p1 = scmp.lt.s32.totalorder %s215_s18, %s660_s8  ;;  %p663_p10 = scmp.lt.s32.totalorder %s661_s10, %s654_s21 }
  0x2e   : > { %p658_p7 = pneg %p657_p4 }
  0x2f   : > { %p664_p13 = por %p663_p10, %p662_p1 }
  0x31   : > { %p665_p3 = pnand %p664_p13, %p658_p7 }
  0x33   : > { %668 = shalt.err (!%p665_p3)
}
  0x34   : > { %542 = dma.hbm_to_vmem [thread:$0]  (!%p886_p0), %s212_s7, 16, %s215_s18, %s203_s19  }
  0x35   : > { %223 = sbr.rel (%p903_p5) target bundleno = 130 (0x82), region = 28  ;;  %s920_s28 = sand.u32 (!%p903_p5), 1, %s767_s13  }
  0x36   : > { %s514_s22 = sshll.u32 (!%p903_p5), %s920_s28, 3  ;;  %s226_s23 = scalar_lea.sflag (!%p903_p5), [#allocation3], %s920_s28 }
  0x37   : > { %s229_s29 = scalar_lea.vmem (!%p903_p5), [#allocation2], %s514_s22 }
  0x3a   : > { %746 = dma.done.wait (%p859_p8), %s226_s23, 128  }
  0x3b   : > { %748 = vsyncadd (%p859_p8), %s226_s23, 4294967168  ;;  %s235_s9 = scalar_lea.sflag [#allocation6], %s920_s28  ;;  %s237_s30 = scalar_lea.vmem [#allocation5], %s920_s28 }
  0x3c   : > { %750 = dma.done.wait (%p859_p8), %s235_s9, 16  }
  0x3d   : > { %752 = vsyncadd (%p859_p8), %s235_s9, 4294967280  ;;  %s934_s4 = scalar_lea.vmem [#allocation7], %s514_s22  ;;  %v789_v0 = vmov 0.0   ;;  %s937_s5 = scalar_lea.vmem [#allocation8], %s514_s22  ;;  %v277_v1 = vld [vmem:[%s237_s30] sm:$0x1] }
  0x3e   : > { %275 = vst [vmem:[%s934_s4] sm:$0xff] %v789_v0  ;;  %276 = vst [vmem:[%s937_s5] sm:$0xff] %v789_v0  ;;  %v280_v2 = vld [vmem:[%s229_s29] sm:$0x3]  ;;  %v517_v3 = vld [vmem:[%s229_s29 + $0x2] sm:$0x3]  ;;  %v278_v4 = vunpack.c.0.s8 %v277_v1  ;;  %s365_s24 = sshll.u32 %s937_s5, 4  ;;  %s523_s7 = sshll.u32 %s775_s15, 7  ;;  %s948_s24 = int_to_ptr.vmem [resolvable:$true] %s365_s24 }
  0x3f   : > { %v283_v5 = vmax.f32 %v280_v2, %v517_v3  ;;  %v518_v6 = vld [vmem:[%s229_s29 + $0x4] sm:$0x3]  ;;  %v519_v7 = vld [vmem:[%s229_s29 + $0x6] sm:$0x3]  ;;  %s955_s19 = scalar_lea.hbm %s1038_s3, %s523_s7  ;;  %s337_s21 = scalar_lea.sflag [#allocation9], %s920_s28 }
  0x40   : > { %v940_v9 = vand.u32 255, %v278_v4  ;;  %s669_s6 = scalar_lea.vmem %s948_s24, 128  ;;  %s790_s8 = smov [#allocation8]  }
  0x41   : > { %v286_v8 = vmax.f32 %v283_v5, %v518_v6  ;;  %p670_p8 = scmp.ne.s32.totalorder %s948_s24, %s669_s6  ;;  %s673_s10 = sshll.u32 %s790_s8, 4  ;;  %s674_s10 = int_to_ptr.vmem [resolvable:$false] %s673_s10 }
  0x42   : > { %vm318_vm0 = vcmp.ne.s32.totalorder %v940_v9, 255  ;;  %s675_s22 = scalar_lea.vmem %s674_s10, 256  ;;  %p676_p5 = scmp.lt.s32.totalorder %s948_s24, %s674_s10 }
  0x43   : > { %v289_v10 = vmax.f32 %v286_v8, %v519_v7  ;;  %v520_v15 = vsel %vm318_vm0, 1.0, %v789_v0  ;;  %p671_p0 = pnand %p670_p8, %p863_p9  ;;  %p677_p6 = scmp.lt.s32.totalorder %s675_s22, %s669_s6 }
  0x45   : > { %v290_v11 = vsub.f32 %v280_v2, %v289_v10  ;;  %v297_v12 = vsub.f32 %v517_v3, %v289_v10  ;;  %v304_v13 = vsub.f32 %v518_v6, %v289_v10  ;;  %v311_v14 = vsub.f32 %v519_v7, %v289_v10  ;;  %v328_v16 = vld [vmem:[%s937_s5] sm:$0x3]  ;;  %p672_p2 = pneg %p671_p0  ;;  %p678_p4 = por %p677_p6, %p676_p5 }
  0x46   : > { %v329_v21 = vadd.f32 %v520_v15, %v328_v16 }
  0x47   : > { %v291_v17 = vmul.f32 1.442695, %v290_v11  ;;  %v298_v18 = vmul.f32 1.442695, %v297_v12  ;;  %v305_v19 = vmul.f32 1.442695, %v304_v13  ;;  %p679_p7 = pnand %p678_p4, %p672_p2 }
  0x48   : > { %v312_v20 = vmul.f32 1.442695, %v311_v14  ;;  %330 = vst [vmem:[%s937_s5] sm:$0x3] %v329_v21 }
  0x49   : > { %603 = vpow2.f32 %v291_v17 }
  0x4a   : > { %605 = vpow2.f32 %v298_v18 }
  0x4b   : > { %607 = vpow2.f32 %v305_v19 }
  0x4c   : > { %609 = vpow2.f32 %v312_v20 }
  0x4d   : > { %682 = shalt.err (!%p679_p7)
}
  0x4e   : > { %s683_s23 = scalar_lea.hbm %s955_s19, 128  ;;  %s687_s30 = scalar_lea.hbm %s1038_s3, 256 }
  0x4f   : > { %p684_p1 = scmp.ne.s32.totalorder %s955_s19, %s683_s23  ;;  %p688_p3 = scmp.lt.s32.totalorder %s955_s19, %s1038_s3 }
  0x50   : > { %p689_p8 = scmp.lt.s32.totalorder %s687_s30, %s683_s23 }
  0x51   : > { %p685_p10 = pnand %p684_p1, %p863_p9 }
  0x52   : > { %p690_p0 = por %p689_p8, %p688_p3 }
  0x53   : > { %p686_p13 = pneg %p685_p10 }
  0x55   : > { %p691_p2 = pnand %p690_p0, %p686_p13 }
  0x57   : > { %694 = shalt.err (!%p691_p2)
}
  0x58   : > { %533 = dma.vmem_to_hbm [thread:$0]  (%p863_p9), %s948_s24, 128, %s955_s19, %s337_s21   ;;  %v604_v22 = vpop.eup %603  ;;  %vm294_vm1 = vcmp.eq.s32.totalorder %v940_v9, 0  ;;  %vm301_vm2 = vcmp.eq.s32.totalorder %v940_v9, 1  ;;  %vm308_vm3 = vcmp.eq.s32.totalorder %v940_v9, 2  ;;  %vm315_vm4 = vcmp.eq.s32.totalorder %v940_v9, 3 }
  0x59   : > { %v606_v23 = vpop.eup %605  ;;  %v295_v29 = vsel %vm294_vm1, %v290_v11, 0.0  ;;  %v302_v30 = vsel %vm301_vm2, %v297_v12, 0.0  ;;  %v309_v32 = vsel %vm308_vm3, %v304_v13, 0.0  ;;  %v316_v34 = vsel %vm315_vm4, %v311_v14, 0.0  ;;  %s351_s24 = sshll.u32 %s934_s4, 4  ;;  %s349_s21 = scalar_lea.hbm %s1037_s2, %s523_s7  ;;  %s987_s24 = int_to_ptr.vmem [resolvable:$true] %s351_s24 }
  0x5a   : > { %v608_v24 = vpop.eup %607  ;;  %v300_v25 = vadd.f32 %v606_v23, %v604_v22  ;;  %v303_v31 = vadd.f32 %v302_v30, %v295_v29  ;;  %v325_v39 = vld [vmem:[%s934_s4] sm:$0x3]  ;;  %s332_s6 = scalar_lea.sflag [#allocation4], %s920_s28  ;;  %s695_s8 = scalar_lea.vmem %s987_s24, 128 }
  0x5b   : > { %v610_v26 = vpop.eup %609  ;;  %p696_p5 = scmp.ne.s32.totalorder %s987_s24, %s695_s8  ;;  %s791_s10 = smov [#allocation7]  }
  0x5c   : > { %v307_v27 = vadd.f32 %v608_v24, %v300_v25  ;;  %v310_v33 = vadd.f32 %v309_v32, %v303_v31  ;;  %s699_s22 = sshll.u32 %s791_s10, 4  ;;  %s700_s22 = int_to_ptr.vmem [resolvable:$false] %s699_s22 }
  0x5d   : > { %p697_p6 = pnand %p696_p5, %p863_p9  ;;  %s701_s23 = scalar_lea.vmem %s700_s22, 256 }
  0x5e   : > { %v314_v28 = vadd.f32 %v610_v26, %v307_v27  ;;  %v317_v35 = vadd.f32 %v316_v34, %v310_v33  ;;  %p702_p7 = scmp.lt.s32.totalorder %s987_s24, %s700_s22  ;;  %p703_p1 = scmp.lt.s32.totalorder %s701_s23, %s695_s8 }
  0x5f   : > { %p698_p4 = pneg %p697_p6 }
  0x60   : > { %611 = vlog2.f32 %v314_v28  ;;  %p704_p10 = por %p703_p1, %p702_p7 }
  0x62   : > { %p705_p13 = pnand %p704_p10, %p698_p4 }
  0x6d   : > { %v612_v36 = vpop.eup %611 }
  0x6e   : > { %v320_v37 = vmul.f32 0.6931472, %v612_v36 }
  0x70   : > { %v321_v38 = vsub.f32 %v320_v37, %v317_v35 }
  0x72   : > { %v322_v40 = vsel %vm318_vm0, %v321_v38, 0.0 }
  0x73   : > { %v326_v41 = vadd.f32 %v325_v39, %v322_v40 }
  0x75   : > { %327 = vst [vmem:[%s934_s4] sm:$0x3] %v326_v41 }
  0x76   : > { %708 = shalt.err (!%p705_p13)
}
  0x77   : > { %s709_s15 = scalar_lea.hbm %s349_s21, 128  ;;  %s713_s7 = scalar_lea.hbm %s1037_s2, 256 }
  0x78   : > { %p710_p3 = scmp.ne.s32.totalorder %s349_s21, %s709_s15  ;;  %p714_p2 = scmp.lt.s32.totalorder %s349_s21, %s1037_s2 }
  0x79   : > { %p715_p5 = scmp.lt.s32.totalorder %s713_s7, %s709_s15 }
  0x7a   : > { %p711_p8 = pnand %p710_p3, %p863_p9 }
  0x7b   : > { %p716_p6 = por %p715_p5, %p714_p2 }
  0x7c   : > { %p712_p0 = pneg %p711_p8 }
  0x7e   : > { %p717_p12 = pnand %p716_p6, %p712_p0 }
  0x80   : > { %720 = shalt.err (!%p717_p12)
}
  0x81   : > { %532 = dma.vmem_to_hbm [thread:$0]  (%p863_p9), %s987_s24, 128, %s349_s21, %s332_s6  }
  0x82 PF: > { %s377_s30 = sand.u32 1, %s763_s12   ;;  %p1045_p4 = scmp.ge.s32.totalorder %s783_s17, 2 }
  0x83   : > { %s378_s5 = scalar_lea.sflag [#allocation4], %s377_s30 }
  0x84   : > { %p544_p7 = pnand %p1045_p4, %p870_p11 }
  0x86   : > { %p545_p1 = pneg %p544_p7 }
  0x88   : > { %754 = dma.done.wait (%p545_p1), %s378_s5, 128  }
  0x89   : > { %756 = vsyncadd (%p545_p1), %s378_s5, 4294967168  ;;  %s387_s11 = scalar_lea.sflag [#allocation9], %s377_s30 }
  0x8a   : > { %758 = dma.done.wait (%p545_p1), %s387_s11, 128  }
  0x8b   : > { %760 = vsyncadd (%p545_p1), %s387_s11, 4294967168  ;;  %s26_s17 = sadd.s32 1, %s783_s17   ;;  %s1046_s12 = smov %s767_s13 }
  0x8c   : > { %p23_p12 = scmp.ge.s32.totalorder %s26_s17, 4   ;;  %s1047_s13 = smov %s771_s14 }
  0x8d   : > { %s1048_s14 = smov %s868_s26  ;;  %s1049_s15 = smov %s779_s16 }
  0x8e   : > { %s1050_s16 = smov %s1052_s20  ;;  %25 = sbr.rel (!%p23_p12) target bundleno = 10 (0xa), region = 110 }
  0x93   :  { %392 = vsyncpa [#allocation3], 1 }
  0x94   :  { %394 = vsyncpa [#allocation3 + $0x1], 1 }
  0x95   :  { %395 = vsyncpa [#allocation6], 1 }
  0x96   :  { %397 = vsyncpa [#allocation6 + $0x1], 1 }
  0x97   :  { %398 = vsyncpa [#allocation4], 1 }
  0x98   :  { %400 = vsyncpa [#allocation4 + $0x1], 1 }
  0x99   :  { %401 = vsyncpa [#allocation9], 1 }
  0x9a   :  { %403 = vsyncpa [#allocation9 + $0x1], 1 }

</bundles_post_ra>
